<compile_context>
chip_gen: v5e
topology: v5e:2x2
jax: 0.10.0
libtpu: 0.0.40
codegen_flags: <defaults>
</compile_context>

<pallas_src>
import math
import functools

import jax
import jax.numpy as jnp
from jax.experimental import pallas as pl
from jax.experimental.pallas import tpu as pltpu

_INV_SQRT2 = 1.0 / math.sqrt(2.0)

# Conservative budget for our own VMEM buffers (fits v7x's 64 MiB physical VMEM
# with headroom for compiler scratch; well inside v5e/v6e's 128 MiB).
_VMEM_BUDGET = 40 * 1024 * 1024
_VMEM_LIMIT = 56 * 1024 * 1024


def _mlp_kernel(x_ref, wfc_ref, bfc_ref, wproj_ref, bproj_ref, o_ref, acc_ref):
    # x_ref:     (tm, C)   row tile of flattened tokens (constant over k)
    # wfc_ref:   (C, th)   chunk of fc weight along the hidden dim
    # bfc_ref:   (1, th)   matching fc bias chunk
    # wproj_ref: (th, C)   chunk of proj weight along the hidden dim
    # bproj_ref: (1, C)    proj bias
    # o_ref:     (tm, C)   output tile (written on the last hidden chunk)
    # acc_ref:   (tm, C)   f32 accumulator (VMEM scratch)
    k = pl.program_id(1)

    @pl.when(k == 0)
    def _():
        acc_ref[...] = jnp.zeros_like(acc_ref)

    # c_fc chunk on the MXU: native-dtype inputs, f32 accumulation.
    h = jnp.dot(x_ref[...], wfc_ref[...], preferred_element_type=jnp.float32)
    h = h + bfc_ref[...].astype(jnp.float32)

    # Exact erf GELU (matches torch.nn.GELU() default); f32 epilogue.
    # TODO(synk): for VALU-bound small-C configs a tanh-approx GELU (EUP slot)
    # or bf16 epilogue on v6e/v7x would recover MXU utilization.
    h = 0.5 * h * (1.0 + jax.lax.erf(h * _INV_SQRT2))

    # c_proj chunk: cast activations to the weight dtype only for the MXU
    # (no-op when weights are f32), accumulate in f32.
    acc_ref[...] += jnp.dot(h.astype(wproj_ref.dtype), wproj_ref[...],
                            preferred_element_type=jnp.float32)

    @pl.when(k == pl.num_programs(1) - 1)
    def _():
        # Dropout: inference semantics -> identity.
        # TODO(synk): training-mode dropout needs pltpu.prng_seed/prng_random_bits.
        o_ref[...] = (acc_ref[...] + bproj_ref[...].astype(jnp.float32)
                      ).astype(o_ref.dtype)


def _round_up(x, m):
    return ((x + m - 1) // m) * m


def _select_tiles(M, C, H, x_itemsize, w_itemsize, tile_m, tile_h):
    """Pick (tm, th) under the VMEM budget, preferring resident weights."""
    # Sublane-packing multiple of the activation dtype (8 f32 / 16 bf16 / 32 int8).
    sub = max(8, 32 // x_itemsize)

    def vmem_est(tm, th):
        xb = 2 * tm * C * x_itemsize                              # x tile, dbl-buffered
        ob = 2 * tm * C * x_itemsize                              # out tile, dbl-buffered
        acc = tm * C * 4                                          # f32 accumulator
        htmp = tm * th * 4                                        # f32 hidden chunk temp
        wb = 2 * ((C * th) + (th * C) + th + C) * w_itemsize      # weights + biases
        return xb + ob + acc + htmp + wb

    tm = _round_up(min(tile_m, _round_up(M, sub)), sub)

    # Weight-resident path: th = H means the weight block indices are constant
    # over the whole grid, so Pallas fetches Wfc/Wproj from HBM exactly once.
    if vmem_est(tm, H) <= _VMEM_BUDGET:
        th = H
        # Megacore (v7x): prefer >=2 row tiles so both TensorCores get work.
        if tm >= M and M > 256:
            tm = _round_up((M + 1) // 2, sub)
    else:
        # Streaming path: 128/256-aligned hidden chunk; caller zero-pads H.
        th = _round_up(min(tile_h, _round_up(H, 128)), 128)
        while vmem_est(tm, th) > _VMEM_BUDGET and th > 256:
            th = max(256, _round_up(th // 2, 128))
        while vmem_est(tm, th) > _VMEM_BUDGET and tm > 2 * sub:
            tm = _round_up(tm // 2, sub)
    return tm, th


@functools.partial(jax.jit, static_argnames=("tile_m", "tile_h"))
def mlp_forward(x, w_fc, b_fc, w_proj, b_proj, *, tile_m=512, tile_h=512):
    """x: (B, T, C). w_fc: (C, 4C), b_fc: (4C,), w_proj: (4C, C), b_proj: (C,)."""
    B, T, C = x.shape
    H = w_fc.shape[1]
    M = B * T

    tm, th = _select_tiles(M, C, H, x.dtype.itemsize, w_fc.dtype.itemsize,
                           tile_m, tile_h)

    M_pad = _round_up(M, tm)
    H_pad = _round_up(H, th)

    x2d = x.reshape(M, C)
    if M_pad != M:
        x2d = jnp.pad(x2d, ((0, M_pad - M), (0, 0)))

    # Zero-padding H is numerically safe: padded Wfc columns / bfc entries are 0
    # => gelu(0) = 0, and padded Wproj rows are 0 => zero contribution.
    if H_pad != H:
        w_fc = jnp.pad(w_fc, ((0, 0), (0, H_pad - H)))
        b_fc = jnp.pad(b_fc, ((0, H_pad - H),))
        w_proj = jnp.pad(w_proj, ((0, H_pad - H), (0, 0)))

    b_fc2 = b_fc.reshape(1, H_pad)
    b_proj2 = b_proj.reshape(1, C)

    grid = (M_pad // tm, H_pad // th)

    # Cost estimate: weights are re-streamed once per M tile unless resident.
    weight_stream = 1 if th == H_pad else grid[0]
    flops = 4 * M_pad * C * H_pad  # two matmuls, 2*M*C*H each
    weight_bytes = ((w_fc.size + w_proj.size) * w_fc.dtype.itemsize
                    + b_fc.size * b_fc.dtype.itemsize
                    + b_proj.size * b_proj.dtype.itemsize)
    bytes_accessed = (x2d.size * x2d.dtype.itemsize
                      + weight_stream * weight_bytes
                      + M_pad * C * x.dtype.itemsize)

    out2d = pl.pallas_call(
        _mlp_kernel,
        out_shape=jax.ShapeDtypeStruct((M_pad, C), x.dtype),
        grid_spec=pltpu.PrefetchScalarGridSpec(
            num_scalar_prefetch=0,
            grid=grid,
            in_specs=[
                pl.BlockSpec((tm, C), lambda i, k: (i, 0)),   # x tile (const over k)
                pl.BlockSpec((C, th), lambda i, k: (0, k)),   # Wfc chunk
                pl.BlockSpec((1, th), lambda i, k: (0, k)),   # bfc chunk
                pl.BlockSpec((th, C), lambda i, k: (k, 0)),   # Wproj chunk
                pl.BlockSpec((1, C), lambda i, k: (0, 0)),    # bproj
            ],
            out_specs=pl.BlockSpec((tm, C), lambda i, k: (i, 0)),
            scratch_shapes=[pltpu.VMEM((tm, C), jnp.float32)],
        ),
        compiler_params=pltpu.CompilerParams(
            dimension_semantics=("parallel", "arbitrary"),
            vmem_limit_bytes=_VMEM_LIMIT,
        ),
        cost_estimate=pl.CostEstimate(
            flops=flops,
            transcendentals=M_pad * H_pad,
            bytes_accessed=bytes_accessed,
        ),
    )(x2d, w_fc, b_fc2, w_proj, b_proj2)

    if M_pad != M:
        out2d = out2d[:M]
    return out2d.reshape(B, T, C)


def _reference_mlp(x, w_fc, b_fc, w_proj, b_proj):
    h = jnp.einsum("btc,ch->bth", x, w_fc) + b_fc
    h = 0.5 * h * (1.0 + jax.lax.erf(h / jnp.sqrt(2.0)))
    y = jnp.einsum("bth,hc->btc", h, w_proj) + b_proj
    return y  # dropout is identity in eval


if __name__ == "__main__":
    # Small config consistent with the module: n_embd=32, bias=True, dropout=0.0
    B, T, C = 2, 8, 32
    H = 4 * C

    key = jax.random.PRNGKey(0)
    kx, kwfc, kbfc, kwproj, kbproj = jax.random.split(key, 5)

    x = jax.random.normal(kx, (B, T, C), dtype=jnp.float32)
    # deterministic "Linear-like" init (uniform in +/- 1/sqrt(fan_in))
    w_fc = jax.random.uniform(kwfc, (C, H), jnp.float32,
                              -1.0 / math.sqrt(C), 1.0 / math.sqrt(C))
    b_fc = jax.random.uniform(kbfc, (H,), jnp.float32,
                              -1.0 / math.sqrt(C), 1.0 / math.sqrt(C))
    w_proj = jax.random.uniform(kwproj, (H, C), jnp.float32,
                                -1.0 / math.sqrt(H), 1.0 / math.sqrt(H))
    b_proj = jax.random.uniform(kbproj, (C,), jnp.float32,
                                -1.0 / math.sqrt(H), 1.0 / math.sqrt(H))

    out = mlp_forward(x, w_fc, b_fc, w_proj, b_proj)
    out = jax.block_until_ready(out)

    ref = _reference_mlp(x, w_fc, b_fc, w_proj, b_proj)
    assert out.shape == (B, T, C)
    assert jnp.allclose(out, ref, atol=1e-5, rtol=1e-5), "mismatch vs reference"

    print("KERNEL_OK")
</pallas_src>

<mosaic_0001>
module attributes {stable_mosaic.version = 11 : i64} {
  func.func @_mlp_kernel(%arg0: i32, %arg1: i32, %arg2: memref<16x32xf32, #tpu.memory_space<vmem>>, %arg3: memref<32x128xf32, #tpu.memory_space<vmem>>, %arg4: memref<1x128xf32, #tpu.memory_space<vmem>>, %arg5: memref<128x32xf32, #tpu.memory_space<vmem>>, %arg6: memref<1x32xf32, #tpu.memory_space<vmem>>, %arg7: memref<16x32xf32, #tpu.memory_space<vmem>>, %arg8: memref<16x32xf32, #tpu.memory_space<vmem>>) attributes {dimension_semantics = [#tpu.dimension_semantics<parallel>, #tpu.dimension_semantics<arbitrary>], iteration_bounds = array<i64: 1, 1>, scalar_prefetch = 0 : i64, scratch_operands = 1 : i64, tpu.core_type = #tpu.core_type<tc>, window_params = [{transform_indices = @transform_0, window_bounds = array<i64: 16, 32>}, {transform_indices = @transform_1, window_bounds = array<i64: 32, 128>}, {transform_indices = @transform_2, window_bounds = array<i64: 1, 128>}, {transform_indices = @transform_3, window_bounds = array<i64: 128, 32>}, {pipeline_mode = #tpu.pipeline_mode<synchronous>, transform_indices = @transform_4, window_bounds = array<i64: 1, 32>}, {transform_indices = @transform_5, window_bounds = array<i64: 16, 32>}]} {
    %c0_i32 = arith.constant 0 : i32
    %0 = arith.cmpi eq, %arg1, %c0_i32 : i32
    %1 = arith.extui %0 : i1 to i32
    %c0_i32_0 = arith.constant 0 : i32
    %2 = arith.cmpi ne, %1, %c0_i32_0 : i32
    scf.if %2 {
      %cst_18 = arith.constant 0.000000e+00 : f32
      %25 = vector.broadcast %cst_18 : f32 to vector<16x32xf32>
      %c0_19 = arith.constant 0 : index
      %c0_20 = arith.constant 0 : index
      %26 = vector.load %arg8[%c0_19, %c0_20] : memref<16x32xf32, #tpu.memory_space<vmem>>, vector<16x32xf32>
      tpu.vector_store %arg8[%c0_19, %c0_20], %25 {strides = array<i32>} : memref<16x32xf32, #tpu.memory_space<vmem>>, vector<16x32xf32>,
    } else {
    }
    %c0 = arith.constant 0 : index
    %c0_1 = arith.constant 0 : index
    %3 = vector.load %arg2[%c0, %c0_1] : memref<16x32xf32, #tpu.memory_space<vmem>>, vector<16x32xf32>
    %c0_2 = arith.constant 0 : index
    %c0_3 = arith.constant 0 : index
    %4 = vector.load %arg3[%c0_2, %c0_3] : memref<32x128xf32, #tpu.memory_space<vmem>>, vector<32x128xf32>
    %cst = arith.constant dense<0.000000e+00> : vector<16x128xf32>
    %5 = tpu.matmul %3, %4, %cst {dimension_numbers = #tpu.dot_dimension_numbers<[1], [0], [0], [1], [0, 0, 1, 1], [], []>} : vector<16x32xf32>, vector<32x128xf32>, vector<16x128xf32> -> vector<16x128xf32>
    %c0_4 = arith.constant 0 : index
    %c0_5 = arith.constant 0 : index
    %6 = vector.load %arg4[%c0_4, %c0_5] : memref<1x128xf32, #tpu.memory_space<vmem>>, vector<1x128xf32>
    %7 = vector.broadcast %6 : vector<1x128xf32> to vector<16x128xf32>
    %8 = arith.addf %5, %7 : vector<16x128xf32>
    %cst_6 = arith.constant 5.000000e-01 : f32
    %9 = vector.broadcast %cst_6 : f32 to vector<16x128xf32>
    %10 = arith.mulf %9, %8 : vector<16x128xf32>
    %cst_7 = arith.constant 0.707106769 : f32
    %11 = vector.broadcast %cst_7 : f32 to vector<16x128xf32>
    %12 = arith.mulf %8, %11 : vector<16x128xf32>
    %13 = math.erf %12 : vector<16x128xf32>
    %cst_8 = arith.constant 1.000000e+00 : f32
    %14 = vector.broadcast %cst_8 : f32 to vector<16x128xf32>
    %15 = arith.addf %14, %13 : vector<16x128xf32>
    %16 = arith.mulf %10, %15 : vector<16x128xf32>
    %c0_9 = arith.constant 0 : index
    %c0_10 = arith.constant 0 : index
    %17 = vector.load %arg8[%c0_9, %c0_10] : memref<16x32xf32, #tpu.memory_space<vmem>>, vector<16x32xf32>
    %c0_11 = arith.constant 0 : index
    %c0_12 = arith.constant 0 : index
    %18 = vector.load %arg5[%c0_11, %c0_12] : memref<128x32xf32, #tpu.memory_space<vmem>>, vector<128x32xf32>
    %cst_13 = arith.constant dense<0.000000e+00> : vector<16x32xf32>
    %19 = tpu.matmul %16, %18, %cst_13 {dimension_numbers = #tpu.dot_dimension_numbers<[1], [0], [0], [1], [0, 0, 1, 1], [], []>} : vector<16x128xf32>, vector<128x32xf32>, vector<16x32xf32> -> vector<16x32xf32>
    %20 = arith.addf %17, %19 : vector<16x32xf32>
    %c0_14 = arith.constant 0 : index
    %c0_15 = arith.constant 0 : index
    %21 = vector.load %arg8[%c0_14, %c0_15] : memref<16x32xf32, #tpu.memory_space<vmem>>, vector<16x32xf32>
    tpu.vector_store %arg8[%c0_14, %c0_15], %20 {strides = array<i32>} : memref<16x32xf32, #tpu.memory_space<vmem>>, vector<16x32xf32>,
    %c0_i32_16 = arith.constant 0 : i32
    %22 = arith.cmpi eq, %arg1, %c0_i32_16 : i32
    %23 = arith.extui %22 : i1 to i32
    %c0_i32_17 = arith.constant 0 : i32
    %24 = arith.cmpi ne, %23, %c0_i32_17 : i32
    scf.if %24 {
      %c0_18 = arith.constant 0 : index
      %c0_19 = arith.constant 0 : index
      %25 = vector.load %arg8[%c0_18, %c0_19] : memref<16x32xf32, #tpu.memory_space<vmem>>, vector<16x32xf32>
      %c0_20 = arith.constant 0 : index
      %c0_21 = arith.constant 0 : index
      %26 = vector.load %arg6[%c0_20, %c0_21] : memref<1x32xf32, #tpu.memory_space<vmem>>, vector<1x32xf32>
      %27 = vector.broadcast %26 : vector<1x32xf32> to vector<16x32xf32>
      %28 = arith.addf %25, %27 : vector<16x32xf32>
      %c0_22 = arith.constant 0 : index
      %c0_23 = arith.constant 0 : index
      %29 = vector.load %arg7[%c0_22, %c0_23] : memref<16x32xf32, #tpu.memory_space<vmem>>, vector<16x32xf32>
      tpu.vector_store %arg7[%c0_22, %c0_23], %28 {strides = array<i32>} : memref<16x32xf32, #tpu.memory_space<vmem>>, vector<16x32xf32>,
    } else {
    }
    return
  }
  func.func @transform_0(%arg0: i32, %arg1: i32) -> (i32, i32) {
    %c0_i32 = arith.constant 0 : i32
    %c0_i32_0 = arith.constant 0 : i32
    return %arg0, %c0_i32 : i32, i32
  }
  func.func @transform_1(%arg0: i32, %arg1: i32) -> (i32, i32) {
    %c0_i32 = arith.constant 0 : i32
    %c0_i32_0 = arith.constant 0 : i32
    return %c0_i32, %arg1 : i32, i32
  }
  func.func @transform_2(%arg0: i32, %arg1: i32) -> (i32, i32) {
    %c0_i32 = arith.constant 0 : i32
    %c0_i32_0 = arith.constant 0 : i32
    return %c0_i32, %arg1 : i32, i32
  }
  func.func @transform_3(%arg0: i32, %arg1: i32) -> (i32, i32) {
    %c0_i32 = arith.constant 0 : i32
    %c0_i32_0 = arith.constant 0 : i32
    return %arg1, %c0_i32 : i32, i32
  }
  func.func @transform_4(%arg0: i32, %arg1: i32) -> (i32, i32) {
    %c0_i32 = arith.constant 0 : i32
    %c0_i32_0 = arith.constant 0 : i32
    %c0_i32_1 = arith.constant 0 : i32
    return %c0_i32, %c0_i32_0 : i32, i32
  }
  func.func @transform_5(%arg0: i32, %arg1: i32) -> (i32, i32) {
    %c0_i32 = arith.constant 0 : i32
    %c0_i32_0 = arith.constant 0 : i32
    return %arg0, %c0_i32 : i32, i32
  }
}

</mosaic_0001>

<bundles_post_ra>
// kernel: mlp_forward.1
= control target key start
LH: loop header
LB: loop body
LE: loop exit
PB: predicated region body
PF: predicated region fallthrough
CT: control target
= control target key end

     0   :  { %s435_s0 = inlined_call_operand.vmem [shape: f32[16,32], index: 0, kind: input, shape index: {}]   ;;  %s436_s1 = inlined_call_operand.vmem [shape: f32[32,128], index: 1, kind: input, shape index: {}]   ;;  %s437_s2 = inlined_call_operand.vmem [shape: f32[1,128], index: 2, kind: input, shape index: {}]   ;;  %s438_s3 = inlined_call_operand.vmem [shape: f32[128,32], index: 3, kind: input, shape index: {}]   ;;  %s439_s4 = inlined_call_operand.vmem [shape: f32[1,32], index: 4, kind: input, shape index: {}]   ;;  %s440_s5 = inlined_call_operand.hbm [shape: f32[16,32], index: 5, kind: output, shape index: {}]  }
   0x1   :  { %v33_v0 = vld [vmem:[%s436_s1 + $0x18] sm:$0xff]  ;;  %v32_v1 = vld [vmem:[%s436_s1 + $0x10] sm:$0xff]  ;;  %v31_v2 = vld [vmem:[%s436_s1 + $0x8] sm:$0xff] }
   0x2   :  { %57 = vmatpush.msra.mxu0 %v33_v0 }
   0x3   :  { %10 = vsyncpa [#allocation4], 0  ;;  %v30_v3 = vld [vmem:[%s436_s1] sm:$0xff]  ;;  %vm25_vm0 = vcmask 261120   ;;  %v29_v5 = vld [vmem:[%s435_s0 + $0x8] sm:$0xff]  ;;  %v288_v0 = vmov 0.0  }
   0x4   :  { %58 = vmatpush.msra.mxu0 %v32_v1  ;;  %v28_v4 = vld [vmem:[%s435_s0] sm:$0xff]  ;;  %v173_v6 = vld [vmem:[%s438_s3 + $0x78] sm:$0xff]  ;;  %v172_v7 = vld [vmem:[%s438_s3 + $0x70] sm:$0xff]  ;;  %26 = vst.msk [vmem:[#allocation2] sm:$0xff] %vm25_vm0, %v288_v0  ;;  %s289_s10 = smov [#allocation3]   ;;  %s220_s14 = sshll.u32 %s440_s5, 4  ;;  %s221_s14 = int_to_ptr.hbm [resolvable:$true] %s220_s14 }
   0x5   :  { %174 = vmatpush.msra.mxu1 %v173_v6  ;;  %236 = vmatpush.msra.mxu2 %v173_v6  ;;  %v171_v8 = vld [vmem:[%s438_s3 + $0x68] sm:$0xff]  ;;  %v170_v9 = vld [vmem:[%s438_s3 + $0x60] sm:$0xff]  ;;  %v169_v11 = vld [vmem:[%s438_s3 + $0x58] sm:$0xff]  ;;  %27 = vst.msk [vmem:[#allocation2 + $0x8] sm:$0xff] %vm25_vm0, %v288_v0  ;;  %s218_s11 = sshll.u32 %s289_s10, 4  ;;  %s291_s15 = smov 8   ;;  %s219_s11 = int_to_ptr.vmem [resolvable:$true] %s218_s11 }
   0x6   :  { %59 = vmatpush.msra.mxu0 %v31_v2  ;;  %v256_v10 = vld [vmem:[%s437_s2] ss:$0 sm:$0xff]  ;;  %v168_v13 = vld [vmem:[%s438_s3 + $0x50] sm:$0xff]  ;;  %v167_v15 = vld [vmem:[%s438_s3 + $0x48] sm:$0xff] }
   0x7   :  { %175 = vmatpush.msra.mxu1 %v172_v7  ;;  %237 = vmatpush.msra.mxu2 %v172_v7  ;;  %v166_v17 = vld [vmem:[%s438_s3 + $0x40] sm:$0xff]  ;;  %v165_v19 = vld [vmem:[%s438_s3 + $0x38] sm:$0xff]  ;;  %v164_v20 = vld [vmem:[%s438_s3 + $0x30] sm:$0xff] }
   0x8   :  { %60 = vmatpush.msra.mxu0 %v30_v3  ;;  %v163_v23 = vld [vmem:[%s438_s3 + $0x28] sm:$0xff]  ;;  %v162_v27 = vld [vmem:[%s438_s3 + $0x20] sm:$0xff]  ;;  %v161_v30 = vld [vmem:[%s438_s3 + $0x18] sm:$0xff] }
   0x9   :  { %232 = vmatmul.msk.f32.vlgmr.msra.gmra.mxu0 %vm25_vm0, %v28_v4  ;;  %176 = vmatpush.msra.mxu1 %v171_v8  ;;  %v160_v34 = vld [vmem:[%s438_s3 + $0x10] sm:$0xff]  ;;  %v159_v37 = vld [vmem:[%s438_s3 + $0x8] sm:$0xff]  ;;  %v158_v42 = vld [vmem:[%s438_s3] sm:$0xff] }
   0xa   :  { %238 = vmatpush.msra.mxu2 %v171_v8 }
   0xb   :  { %177 = vmatpush.msra.mxu1 %v170_v9 }
   0xc   :  { %239 = vmatpush.msra.mxu2 %v170_v9 }
   0xd   :  { %178 = vmatpush.msra.mxu1 %v169_v11 }
   0xe   :  { %240 = vmatpush.msra.mxu2 %v169_v11 }
   0xf   :  { %179 = vmatpush.msra.mxu1 %v168_v13 }
  0x10   :  { %241 = vmatpush.msra.mxu2 %v168_v13 }
  0x11   :  { %233 = vmatmul.msk.f32.gmra.mxu0 %vm25_vm0, %v29_v5  ;;  %180 = vmatpush.msra.mxu1 %v167_v15 }
  0x12   :  { %242 = vmatpush.msra.mxu2 %v167_v15 }
  0x13   :  { %181 = vmatpush.msra.mxu1 %v166_v17 }
  0x14   :  { %243 = vmatpush.msra.mxu2 %v166_v17 }
  0x15   :  { %182 = vmatpush.msra.mxu1 %v165_v19 }
  0x16   :  { %244 = vmatpush.msra.mxu2 %v165_v19 }
  0x17   :  { %183 = vmatpush.msra.mxu1 %v164_v20 }
  0x18   :  { %245 = vmatpush.msra.mxu2 %v164_v20 }
  0x19   :  { %184 = vmatpush.msra.mxu1 %v163_v23 }
  0x1a   :  { %246 = vmatpush.msra.mxu2 %v163_v23 }
  0x1b   :  { %185 = vmatpush.msra.mxu1 %v162_v27 }
  0x1c   :  { %247 = vmatpush.msra.mxu2 %v162_v27 }
  0x1d   :  { %186 = vmatpush.msra.mxu1 %v161_v30 }
  0x1e   :  { %248 = vmatpush.msra.mxu2 %v161_v30 }
  0x1f   :  { %187 = vmatpush.msra.mxu1 %v160_v34 }
  0x20   :  { %249 = vmatpush.msra.mxu2 %v160_v34 }
  0x21   :  { %188 = vmatpush.msra.mxu1 %v159_v37 }
  0x22   :  { %250 = vmatpush.msra.mxu2 %v159_v37 }
  0x23   :  { %189 = vmatpush.msra.mxu1 %v158_v42 }
  0x24   :  { %251 = vmatpush.msra.mxu2 %v158_v42 }
  0x86   :  { %v62_v12 = vpop.f32.mrf.mxu0 }
  0x87   :  { %v363_v14 = vadd.f32 %v256_v10, %v62_v12 }
  0x89   :  { %v369_v16 = vmul.f32 0.70710677, %v363_v14  ;;  %v68_v34 = vmul.f32 0.5, %v363_v14 }
  0x8b   :  { %v72_v18 = vmul.f32 %v369_v16, %v369_v16 }
  0x8d   :  { %v382_v21 = vmin.f32 %v72_v18, 16.0 }
  0x8e   :  { %v65_v22 = vpop.f32.mrf.mxu0 }
  0x8f   :  { %v74_v24 = vmul.f32 2.1237322e-06, %v382_v21  ;;  %v388_v25 = vadd.f32 %v256_v10, %v65_v22  ;;  %v85_v26 = vmul.f32 3.8918573e-05, %v382_v21 }
  0x91   :  { %v75_v28 = vadd.f32 0.00028619796, %v74_v24  ;;  %v395_v29 = vmul.f32 0.70710677, %v388_v25  ;;  %v86_v31 = vadd.f32 0.001143296, %v85_v26 }
  0x92   :  { %v69_v42 = vmul.f32 0.5, %v388_v25 }
  0x93   :  { %v76_v32 = vmul.f32 %v75_v28, %v382_v21  ;;  %v112_v33 = vmul.f32 %v395_v29, %v395_v29  ;;  %v87_v35 = vmul.f32 %v86_v31, %v382_v21 }
  0x95   :  { %v113_v36 = vmin.f32 %v112_v33, 16.0  ;;  %v88_v38 = vadd.f32 0.014752088, %v87_v35  ;;  %v77_v39 = vadd.f32 0.0036580483, %v76_v32 }
  0x97   :  { %v114_v40 = vmul.f32 2.1237322e-06, %v113_v36  ;;  %v125_v41 = vmul.f32 3.8918573e-05, %v113_v36  ;;  %v89_v43 = vmul.f32 %v88_v38, %v382_v21  ;;  %v78_v47 = vmul.f32 %v77_v39, %v382_v21 }
  0x99   :  { %v115_v44 = vadd.f32 0.00028619796, %v114_v40  ;;  %v126_v45 = vadd.f32 0.001143296, %v125_v41  ;;  %v90_v46 = vadd.f32 0.112945676, %v89_v43 }
  0x9a   :  { %v79_v54 = vadd.f32 0.05243302, %v78_v47 }
  0x9b   :  { %v116_v48 = vmul.f32 %v115_v44, %v113_v36  ;;  %v127_v49 = vmul.f32 %v126_v45, %v113_v36  ;;  %v91_v50 = vmul.f32 %v90_v46, %v382_v21  ;;  %v156_v45 = vld [vmem:[#allocation2] sm:$0xff] }
  0x9c   :  { %v80_v60 = vmul.f32 %v79_v54, %v382_v21 }
  0x9d   :  { %v128_v51 = vadd.f32 0.014752088, %v127_v49  ;;  %v117_v52 = vadd.f32 0.0036580483, %v116_v48  ;;  %v92_v53 = vadd.f32 0.4994258, %v91_v50 }
  0x9e   :  { %v81_v1 = vadd.f32 0.18741608, %v80_v60  ;;  %v157_v48 = vld [vmem:[#allocation2 + $0x8] sm:$0xff] }
  0x9f   :  { %v129_v55 = vmul.f32 %v128_v51, %v113_v36  ;;  %v93_v56 = vmul.f32 %v92_v53, %v382_v21  ;;  %v118_v58 = vmul.f32 %v117_v52, %v113_v36 }
  0xa0   :  { %v82_v6 = vmul.f32 %v81_v1, %v382_v21 }
  0xa1   :  { %v130_v57 = vadd.f32 0.112945676, %v129_v55  ;;  %v94_v59 = vadd.f32 1.0, %v93_v56  ;;  %v119_v63 = vadd.f32 0.05243302, %v118_v58 }
  0xa2   :  { %v83_v11 = vadd.f32 1.1283791, %v82_v6 }
  0xa3   :  { %v131_v61 = vmul.f32 %v130_v57, %v113_v36  ;;  %258 = vrcp.f32 %v94_v59  ;;  %v120_v5 = vmul.f32 %v119_v63, %v113_v36  ;;  %v106_v10 = vand.u32 2147483648, %v94_v59 }
  0xa4   :  { %v104_v13 = vand.u32 2147483647, %v94_v59  ;;  %vm100_vm2 = vweird.f32 %v94_v59  ;;  %v84_v22 = vmul.f32 %v83_v11, %v369_v16 }
  0xa5   :  { %v132_v62 = vadd.f32 0.4994258, %v131_v61  ;;  %v121_v9 = vadd.f32 0.18741608, %v120_v5  ;;  %v107_v19 = vor.u32 1.1754944e-38, %v106_v10 }
  0xa6   :  { %vm105_vm4 = vcmp.eq.f32.partialorder %v104_v13, 8.507059e+37 }
  0xa7   :  { %v133_v2 = vmul.f32 %v132_v62, %v113_v36  ;;  %v122_v18 = vmul.f32 %v121_v9, %v113_v36 }
  0xa9   :  { %v134_v3 = vadd.f32 1.0, %v133_v2  ;;  %v259_v4 = vpop.eup %258  ;;  %v123_v28 = vadd.f32 1.1283791, %v122_v18 }
  0xaa   :  { %v96_v7 = vmul.f32 %v259_v4, %v94_v59  ;;  %vm101_vm1 = vweird.f32 %v259_v4 }
  0xab   :  { %260 = vrcp.f32 %v134_v3  ;;  %vm102_vm3 = vmor %vm100_vm2, %vm101_vm1  ;;  %v146_v27 = vand.u32 2147483648, %v134_v3  ;;  %v144_v31 = vand.u32 2147483647, %v134_v3  ;;  %vm140_vm6 = vweird.f32 %v134_v3 }
  0xac   :  { %v97_v8 = vsub.f32 1.0, %v96_v7  ;;  %v124_v16 = vmul.f32 %v123_v28, %v395_v29  ;;  %v257_v29 = vld [vmem:[%s439_s4] ss:$0 sm:$0xff]  ;;  %s290_s4 = smov 128  }
  0xad   :  { %v147_v36 = vor.u32 1.1754944e-38, %v146_v27  ;;  %vm145_vm8 = vcmp.eq.f32.partialorder %v144_v31, 8.507059e+37 }
  0xae   :  { %v98_v12 = vmul.f32 %v259_v4, %v97_v8 }
  0xb0   :  { %v99_v17 = vadd.f32 %v259_v4, %v98_v12 }
  0xb1   :  { %v261_v15 = vpop.eup %260 }
  0xb2   :  { %v136_v20 = vmul.f32 %v261_v15, %v134_v3  ;;  %v103_v23 = vsel %vm102_vm3, %v259_v4, %v99_v17  ;;  %vm141_vm5 = vweird.f32 %v261_v15 }
  0xb3   :  { %v108_v21 = vsel %vm105_vm4, %v107_v19, %v103_v23  ;;  %vm142_vm7 = vmor %vm140_vm6, %vm141_vm5 }
  0xb4   :  { %v137_v24 = vsub.f32 1.0, %v136_v20  ;;  %v109_v26 = vmul.f32 %v108_v21, %v84_v22 }
  0xb6   :  { %v138_v30 = vmul.f32 %v261_v15, %v137_v24  ;;  %v234_v32 = vclamps-f32 %v109_v26, 1.0 }
  0xb8   :  { %v139_v33 = vadd.f32 %v261_v15, %v138_v30  ;;  %v152_v35 = vadd.f32 1.0, %v234_v32 }
  0xba   :  { %v143_v37 = vsel %vm142_vm7, %v261_v15, %v139_v33  ;;  %v154_v38 = vmul.f32 %v152_v35, %v68_v34 }
  0xbb   :  { %v148_v39 = vsel %vm145_vm8, %v147_v36, %v143_v37 }
  0xbc   :  { %v149_v40 = vmul.f32 %v148_v39, %v124_v16  ;;  %190 = vmatmul.f32.vlgmr.msra.gmra.mxu1 %v154_v38 }
  0xbe   :  { %v235_v41 = vclamps-f32 %v149_v40, 1.0 }
  0xc0   :  { %v153_v43 = vadd.f32 1.0, %v235_v41 }
  0xc2   :  { %v155_v44 = vmul.f32 %v153_v43, %v69_v42 }
  0xc4   :  { %193 = vmatmul.f32.vlgmr.msra.gmra.mxu2 %v155_v44 }
 0x139   :  { %v191_v46 = vpop.f32.mrf.mxu1 }
 0x13a   :  { %v197_v14 = vadd.f32 %v191_v46, %v156_v45 }
 0x13c   :  { %199 = vst.msk [vmem:[#allocation2] sm:$0xff] %vm25_vm0, %v197_v14 }
 0x143   :  { %v204_v47 = vld [vmem:[#allocation2] sm:$0xff] }
 0x144   :  { %v210_v49 = vadd.f32 %v257_v29, %v204_v47 }
 0x146   :  { %212 = vst.msk [vmem:[#allocation3] sm:$0xff] %vm25_vm0, %v210_v49 }
 0x147   :  { %v194_v50 = vpop.f32.mrf.mxu2 }
 0x148   :  { %v198_v51 = vadd.f32 %v194_v50, %v157_v48 }
 0x14a   :  { %200 = vst.msk [vmem:[#allocation2 + $0x8] sm:$0xff] %vm25_vm0, %v198_v51 }
 0x151   :  { %v205_v25 = vld [vmem:[#allocation2 + $0x8] sm:$0xff] }
 0x152   :  { %v211_v52 = vadd.f32 %v257_v29, %v205_v25 }
 0x154   :  { %213 = vst.msk [vmem:[#allocation3 + $0x8] sm:$0xff] %vm25_vm0, %v211_v52 }
 0x155   :  { %226 = dma.vmem_to_hbm [thread:$0]  %s219_s11, 256, %s221_s14, [#allocation4], %s290_s4, %s290_s4, %s291_s15  }
 0x156   :  { %286 = dma.done.wait [#allocation4], 256  }
 0x157   :  { %287 = vsyncadd [#allocation4], 4294967040 }
 0x158   :  { %231 = vsyncpa [#allocation4], 1 }

</bundles_post_ra>
